<compile_context>
chip_gen: v7x
topology: tpu7x:2x2x1
jax: 0.10.0
libtpu: 0.0.40
codegen_flags: <defaults>
</compile_context>

<pallas_src>
import functools
import numpy as np
import jax
import jax.numpy as jnp
from jax.experimental import pallas as pl
from jax.experimental.pallas import tpu as pltpu


# ----------------------------- parameter setup -----------------------------

def _lanczos(x, a):
    x = np.asarray(x, dtype=np.float64)
    eps = 1e-12
    safe = np.where(np.abs(x) < eps, 1.0, x)
    val = a * np.sin(np.pi * safe) * np.sin(np.pi * safe / a) / (np.pi ** 2 * safe ** 2)
    val = np.where(np.abs(x) < eps, 1.0, val)
    return np.where(np.abs(x) >= a, 0.0, val)


def _resize_matrix(in_size, out_size, a=3.0):
    """PIL-style separable Lanczos-3 resampling weights, shape (out_size, in_size)."""
    scale = in_size / out_size
    filterscale = max(scale, 1.0)
    support = a * filterscale
    W = np.zeros((out_size, in_size), dtype=np.float64)
    for i in range(out_size):
        center = (i + 0.5) * scale
        lo = max(int(np.floor(center - support)), 0)
        hi = min(int(np.ceil(center + support)) + 1, in_size)
        ks = np.arange(lo, hi)
        w = _lanczos((ks + 0.5 - center) / filterscale, a)
        s = w.sum()
        if s != 0.0:
            w = w / s
        W[i, ks] = w
    return W.astype(np.float32)


# --------------------------- VMEM sizing helpers ----------------------------

def _round_up(v, m):
    return ((v + m - 1) // m) * m


def _padded_bytes(shape, itemsize):
    """Bytes of a VMEM buffer including (sublane, 128-lane) layout padding."""
    sub = 8 * max(1, 4 // itemsize)          # 8 sublanes f32, 16 bf16, 32 int8
    if len(shape) == 1:
        return _round_up(shape[0], 128) * itemsize
    lead = 1
    for d in shape[:-2]:
        lead *= d
    return lead * _round_up(shape[-2], sub) * _round_up(shape[-1], 128) * itemsize


def _vmem_capacity_bytes():
    """Generation-aware VMEM capacity (v5e/v6e 128 MiB, v7x 64 MiB)."""
    try:
        info = pltpu.get_tpu_info()
        cap = int(getattr(info, "vmem_capacity_bytes", 0))
        if cap > 0:
            return cap
    except Exception:
        pass
    return 64 * 1024 * 1024  # conservative fallback (v7x-sized)


def _estimate_vmem(cb, *, himg, wimg, hnew, wnew, hout, wout,
                   in_item, out_item, w_first):
    """Per-grid-step VMEM estimate incl. layout padding and intermediates."""
    f32 = 4
    b = 0
    b += 2 * _padded_bytes((cb, himg, wimg), in_item)     # input block (double-buffered)
    b += 2 * _padded_bytes((cb, hout, wout), out_item)    # output block (double-buffered)
    b += 2 * (_padded_bytes((hnew, himg), in_item)        # Wh
              + _padded_bytes((wimg, wnew), in_item))     # WwT
    if w_first:
        b += _padded_bytes((cb * himg, wnew), f32)        # width-contraction result (f32)
        b += _padded_bytes((cb * himg, wnew), in_item)    # cast copy fed to 2nd matmul
        b += _padded_bytes((hnew, wnew), f32)             # per-channel height result
    else:
        b += _padded_bytes((cb * hnew, wimg), in_item)    # VMEM scratch of stacked rows
        b += _padded_bytes((hnew, wimg), f32)             # per-channel height result
        b += _padded_bytes((cb * hnew, wnew), f32)        # width-contraction result
    b += _padded_bytes((cb, himg, wimg), in_item)         # x materialized in vregs
    return b


# ------------------------------- Pallas kernel ------------------------------

def _fit_kernel(x_ref, wh_ref, wwt_ref, o_ref, *scratch,
                c_block, himg, wimg, hnew, wnew, tpad, lpad,
                pad_value, do_fill, w_first):
    # x_ref:   (c_block, himg, wimg)
    # wh_ref:  (hnew, himg)
    # wwt_ref: (wimg, wnew)      (already transposed in the wrapper)
    # o_ref:   (c_block, hout, wout)
    # scratch: () or a single VMEM ref (c_block*hnew, wimg) for the h-first path
    cdt = x_ref.dtype
    hout, wout = o_ref.shape[1], o_ref.shape[2]

    if do_fill:
        # Fill only the pad border; the interior is written by the resize below
        # (avoids doubling vector-store work with a full-tile constant fill).
        bpad = hout - tpad - hnew
        rpad = wout - lpad - wnew
        odt = o_ref.dtype
        if tpad > 0:
            o_ref[:, :tpad, :] = jnp.full((c_block, tpad, wout), pad_value, odt)
        if bpad > 0:
            o_ref[:, tpad + hnew:, :] = jnp.full((c_block, bpad, wout), pad_value, odt)
        if lpad > 0:
            o_ref[:, tpad:tpad + hnew, :lpad] = jnp.full((c_block, hnew, lpad),
                                                         pad_value, odt)
        if rpad > 0:
            o_ref[:, tpad:tpad + hnew, lpad + wnew:] = jnp.full((c_block, hnew, rpad),
                                                                pad_value, odt)

    wh = wh_ref[...]      # (hnew, himg)
    wwt = wwt_ref[...]    # (wimg, wnew)

    if w_first:
        # One big MXU matmul for the width contraction across all channels in
        # the block (M = c_block*himg), then a short static per-channel loop for
        # the (smaller) height contraction.  c_block <= 4 for images, so the
        # static unroll keeps vreg pressure bounded.
        x = x_ref[...].reshape(c_block * himg, wimg)
        y = jnp.dot(x, wwt, preferred_element_type=jnp.float32).astype(cdt)
        for c in range(c_block):
            r = jnp.dot(wh, y[c * himg:(c + 1) * himg, :],
                        preferred_element_type=jnp.float32)
            o_ref[c, tpad:tpad + hnew, lpad:lpad + wnew] = r.astype(o_ref.dtype)
    else:
        # Height contraction per channel, written straight into a VMEM scratch
        # (no jnp.concatenate -> no extra copies / vreg live-range blow-up),
        # then one big MXU matmul for the width contraction (M = c_block*hnew).
        y_scr, = scratch                              # (c_block*hnew, wimg)
        for c in range(c_block):
            yc = jnp.dot(wh, x_ref[c], preferred_element_type=jnp.float32)
            y_scr[c * hnew:(c + 1) * hnew, :] = yc.astype(cdt)
        z = jnp.dot(y_scr[...], wwt, preferred_element_type=jnp.float32)
        for c in range(c_block):
            o_ref[c, tpad:tpad + hnew, lpad:lpad + wnew] = \
                z[c * hnew:(c + 1) * hnew, :].astype(o_ref.dtype)


# --------------------------------- wrapper ----------------------------------

def fit(img, bounds, grow=True, pad=None, compute_dtype=None):
    """Equivalent of Fit.forward for a CHW float image with static shapes."""
    bounds = (bounds, bounds) if isinstance(bounds, int) else tuple(bounds)
    C, himg, wimg = img.shape
    hbound, wbound = bounds

    hscale = hbound / himg
    wscale = wbound / wimg
    if not grow:
        hscale = min(hscale, 1.0)
        wscale = min(wscale, 1.0)
    scale = min(hscale, wscale)
    if scale == 1.0:
        return img  # identity shortcut (matches reference semantics)

    # NOTE: Python round() (banker's rounding) to exactly match the reference.
    hnew = min(round(himg * scale), hbound)
    wnew = min(round(wimg * scale), wbound)

    out_dtype = img.dtype
    cdt = jnp.dtype(compute_dtype) if compute_dtype is not None else jnp.dtype(img.dtype)

    Wh = jnp.asarray(_resize_matrix(himg, hnew)).astype(cdt)        # (hnew, himg)
    WwT = jnp.asarray(_resize_matrix(wimg, wnew).T).astype(cdt)     # (wimg, wnew)
    x = img.astype(cdt)

    if pad is None:
        hout, wout, tpad, lpad, pad_value = hnew, wnew, 0, 0, 0.0
    else:
        hout, wout = hbound, wbound
        tpad = (hbound - hnew) // 2
        lpad = (wbound - wnew) // 2
        pad_value = float(pad)
    do_fill = (pad is not None) and (hnew < hbound or wnew < wbound)

    # Contraction order by FLOP count (static).
    flops_w_first = 2 * himg * wimg * wnew + 2 * hnew * himg * wnew
    flops_h_first = 2 * hnew * himg * wimg + 2 * hnew * wimg * wnew
    w_first = flops_w_first <= flops_h_first

    in_item = cdt.itemsize
    out_item = jnp.dtype(out_dtype).itemsize

    # Generation-aware VMEM budgeting (v7x ~48 MiB usable, v5e/v6e ~112 MiB).
    vmem_cap = _vmem_capacity_bytes()
    budget = max(vmem_cap - 16 * 1024 * 1024, 16 * 1024 * 1024)

    est = functools.partial(_estimate_vmem, himg=himg, wimg=wimg, hnew=hnew,
                            wnew=wnew, hout=hout, wout=wout, in_item=in_item,
                            out_item=out_item, w_first=w_first)

    divisors = sorted({d for d in range(1, C + 1) if C % d == 0}, reverse=True)
    if C > 1:
        # Cap c_block to a proper divisor so the grid has >= 2 steps -> both
        # v7x TensorCores get a "parallel" step; negligible cost on v5e/v6e.
        candidates = [d for d in divisors if d < C]
    else:
        candidates = [1]

    c_block = None
    for cand in candidates:
        if est(cand) <= budget:
            c_block = cand
            break
    if c_block is None:
        # TODO(synk): banded row tiling so even huge images fit v7x's 64 MiB.
        c_block = 1
    est_vmem = est(c_block)
    vmem_limit = int(min(budget, max(2 * est_vmem, 16 * 1024 * 1024)))

    kernel = functools.partial(
        _fit_kernel, c_block=c_block, himg=himg, wimg=wimg, hnew=hnew, wnew=wnew,
        tpad=tpad, lpad=lpad, pad_value=pad_value, do_fill=do_fill, w_first=w_first)

    scratch_shapes = []
    if not w_first:
        scratch_shapes.append(pltpu.VMEM((c_block * hnew, wimg), cdt))

    cost = pl.CostEstimate(
        flops=C * min(flops_w_first, flops_h_first),
        transcendentals=0,
        bytes_accessed=(C * himg * wimg * in_item
                        + (hnew * himg + wimg * wnew) * in_item
                        + C * hout * wout * out_item))

    return pl.pallas_call(
        kernel,
        out_shape=jax.ShapeDtypeStruct((C, hout, wout), out_dtype),
        grid_spec=pltpu.PrefetchScalarGridSpec(
            num_scalar_prefetch=0,
            grid=(C // c_block,),
            in_specs=[
                pl.BlockSpec((c_block, himg, wimg), lambda g: (g, 0, 0)),
                pl.BlockSpec((hnew, himg), lambda g: (0, 0)),
                pl.BlockSpec((wimg, wnew), lambda g: (0, 0)),
            ],
            out_specs=pl.BlockSpec((c_block, hout, wout), lambda g: (g, 0, 0)),
            scratch_shapes=scratch_shapes,
        ),
        compiler_params=pltpu.CompilerParams(
            dimension_semantics=("parallel",),
            vmem_limit_bytes=vmem_limit),
        cost_estimate=cost,
    )(x, Wh, WwT)


# ----------------------------------- main ------------------------------------

if __name__ == "__main__":
    key = jax.random.PRNGKey(0)

    # Case 1: 4 channels, 16x16; bounds (h=8, w=12), constant pad 0.5
    # (w_first order, 2-step parallel grid, left/right border fill).
    x = jax.random.uniform(key, (4, 16, 16), dtype=jnp.float32)
    out = jax.block_until_ready(fit(x, bounds=(8, 12), grow=True, pad=0.5))
    assert out.shape == (4, 8, 12), out.shape

    # Case 2: no-pad path (output is just the resized image).
    out2 = jax.block_until_ready(fit(x, bounds=(8, 12), grow=True, pad=None))
    assert out2.shape == (4, 8, 8), out2.shape

    # Reference (plain JAX) for cases 1 & 2.
    Wh = jnp.asarray(_resize_matrix(16, 8))
    Ww = jnp.asarray(_resize_matrix(16, 8))
    ref_resized = jnp.einsum('oh,chw,pw->cop', Wh, x, Ww)
    ref_padded = jnp.pad(ref_resized, ((0, 0), (0, 0), (2, 2)), constant_values=0.5)
    np.testing.assert_allclose(np.asarray(out), np.asarray(ref_padded), rtol=1e-5, atol=1e-5)
    np.testing.assert_allclose(np.asarray(out2), np.asarray(ref_resized), rtol=1e-5, atol=1e-5)

    # Case 3: asymmetric downscale (h-first order + VMEM scratch + top/bottom fill).
    x3 = jax.random.uniform(jax.random.PRNGKey(0), (3, 16, 32), dtype=jnp.float32)
    out3 = jax.block_until_ready(fit(x3, bounds=(8, 8), grow=True, pad=1.0))
    assert out3.shape == (3, 8, 8), out3.shape
    Wh3 = jnp.asarray(_resize_matrix(16, 4))
    Ww3 = jnp.asarray(_resize_matrix(32, 8))
    ref3 = jnp.einsum('oh,chw,pw->cop', Wh3, x3, Ww3)
    ref3 = jnp.pad(ref3, ((0, 0), (2, 2), (0, 0)), constant_values=1.0)
    np.testing.assert_allclose(np.asarray(out3), np.asarray(ref3), rtol=1e-5, atol=1e-5)

    # Case 4: bf16 compute path (halved HBM/VMEM traffic on v6e/v7x), f32 accumulation.
    out4 = jax.block_until_ready(
        fit(x, bounds=(8, 12), grow=True, pad=0.5, compute_dtype=jnp.bfloat16))
    assert out4.shape == (4, 8, 12), out4.shape
    np.testing.assert_allclose(np.asarray(out4), np.asarray(ref_padded), rtol=0, atol=5e-2)

    # Case 5: identity shortcut (scale == 1 with grow=False).
    out5 = fit(x, bounds=(32, 32), grow=False, pad=None)
    assert out5 is x

    print("KERNEL_OK")
</pallas_src>

<mosaic_0001>
module attributes {stable_mosaic.version = 11 : i64} {
  func.func @_fit_kernel(%arg0: i32, %arg1: memref<2x16x16xf32, #tpu.memory_space<vmem>>, %arg2: memref<8x16xf32, #tpu.memory_space<vmem>>, %arg3: memref<16x8xf32, #tpu.memory_space<vmem>>, %arg4: memref<2x8x12xf32, #tpu.memory_space<vmem>>) attributes {dimension_semantics = [#tpu.dimension_semantics<parallel>], iteration_bounds = array<i64: 2>, scalar_prefetch = 0 : i64, scratch_operands = 0 : i64, tpu.core_type = #tpu.core_type<tc>, window_params = [{transform_indices = @transform_0, window_bounds = array<i64: 2, 16, 16>}, {pipeline_mode = #tpu.pipeline_mode<synchronous>, transform_indices = @transform_1, window_bounds = array<i64: 8, 16>}, {pipeline_mode = #tpu.pipeline_mode<synchronous>, transform_indices = @transform_2, window_bounds = array<i64: 16, 8>}, {transform_indices = @transform_3, window_bounds = array<i64: 2, 8, 12>}]} {
    %cst = arith.constant 5.000000e-01 : f32
    %0 = vector.broadcast %cst : f32 to vector<2x8x2xf32>
    %c0 = arith.constant 0 : index
    %c0_0 = arith.constant 0 : index
    %c0_1 = arith.constant 0 : index
    %1 = vector.load %arg4[%c0, %c0_0, %c0_1] : memref<2x8x12xf32, #tpu.memory_space<vmem>>, vector<2x8x2xf32>
    tpu.vector_store %arg4[%c0, %c0_0, %c0_1], %0 {strides = array<i32>} : memref<2x8x12xf32, #tpu.memory_space<vmem>>, vector<2x8x2xf32>,
    %cst_2 = arith.constant 5.000000e-01 : f32
    %2 = vector.broadcast %cst_2 : f32 to vector<2x8x2xf32>
    %c0_3 = arith.constant 0 : index
    %c0_4 = arith.constant 0 : index
    %c10 = arith.constant 10 : index
    %3 = vector.load %arg4[%c0_3, %c0_4, %c10] : memref<2x8x12xf32, #tpu.memory_space<vmem>>, vector<2x8x2xf32>
    tpu.vector_store %arg4[%c0_3, %c0_4, %c10], %2 {strides = array<i32>} : memref<2x8x12xf32, #tpu.memory_space<vmem>>, vector<2x8x2xf32>,
    %c0_5 = arith.constant 0 : index
    %c0_6 = arith.constant 0 : index
    %4 = vector.load %arg2[%c0_5, %c0_6] : memref<8x16xf32, #tpu.memory_space<vmem>>, vector<8x16xf32>
    %c0_7 = arith.constant 0 : index
    %c0_8 = arith.constant 0 : index
    %5 = vector.load %arg3[%c0_7, %c0_8] : memref<16x8xf32, #tpu.memory_space<vmem>>, vector<16x8xf32>
    %c0_9 = arith.constant 0 : index
    %c0_10 = arith.constant 0 : index
    %c0_11 = arith.constant 0 : index
    %6 = vector.load %arg1[%c0_9, %c0_10, %c0_11] : memref<2x16x16xf32, #tpu.memory_space<vmem>>, vector<2x16x16xf32>
    %7 = vector.shape_cast %6 : vector<2x16x16xf32> to vector<32x16xf32>
    %cst_12 = arith.constant dense<0.000000e+00> : vector<32x8xf32>
    %8 = tpu.matmul %7, %5, %cst_12 {dimension_numbers = #tpu.dot_dimension_numbers<[1], [0], [0], [1], [0, 0, 1, 1], [], []>} : vector<32x16xf32>, vector<16x8xf32>, vector<32x8xf32> -> vector<32x8xf32>
    %9 = vector.extract_strided_slice %8 {offsets = [0, 0], sizes = [16, 8], strides = [1, 1]} : vector<32x8xf32> to vector<16x8xf32>
    %cst_13 = arith.constant dense<0.000000e+00> : vector<8x8xf32>
    %10 = tpu.matmul %4, %9, %cst_13 {dimension_numbers = #tpu.dot_dimension_numbers<[1], [0], [0], [1], [0, 0, 1, 1], [], []>} : vector<8x16xf32>, vector<16x8xf32>, vector<8x8xf32> -> vector<8x8xf32>
    %c0_14 = arith.constant 0 : index
    %c0_15 = arith.constant 0 : index
    %c2 = arith.constant 2 : index
    %11 = vector.load %arg4[%c0_14, %c0_15, %c2] : memref<2x8x12xf32, #tpu.memory_space<vmem>>, vector<1x8x8xf32>
    %12 = vector.shape_cast %11 : vector<1x8x8xf32> to vector<8x8xf32>
    %13 = vector.shape_cast %10 : vector<8x8xf32> to vector<1x8x8xf32>
    tpu.vector_store %arg4[%c0_14, %c0_15, %c2], %13 {strides = array<i32>} : memref<2x8x12xf32, #tpu.memory_space<vmem>>, vector<1x8x8xf32>,
    %14 = vector.extract_strided_slice %8 {offsets = [16, 0], sizes = [16, 8], strides = [1, 1]} : vector<32x8xf32> to vector<16x8xf32>
    %cst_16 = arith.constant dense<0.000000e+00> : vector<8x8xf32>
    %15 = tpu.matmul %4, %14, %cst_16 {dimension_numbers = #tpu.dot_dimension_numbers<[1], [0], [0], [1], [0, 0, 1, 1], [], []>} : vector<8x16xf32>, vector<16x8xf32>, vector<8x8xf32> -> vector<8x8xf32>
    %c1 = arith.constant 1 : index
    %c0_17 = arith.constant 0 : index
    %c2_18 = arith.constant 2 : index
    %16 = vector.load %arg4[%c1, %c0_17, %c2_18] : memref<2x8x12xf32, #tpu.memory_space<vmem>>, vector<1x8x8xf32>
    %17 = vector.shape_cast %16 : vector<1x8x8xf32> to vector<8x8xf32>
    %18 = vector.shape_cast %15 : vector<8x8xf32> to vector<1x8x8xf32>
    tpu.vector_store %arg4[%c1, %c0_17, %c2_18], %18 {strides = array<i32>} : memref<2x8x12xf32, #tpu.memory_space<vmem>>, vector<1x8x8xf32>,
    return
  }
  func.func @transform_0(%arg0: i32) -> (i32, i32, i32) {
    %c0_i32 = arith.constant 0 : i32
    %c0_i32_0 = arith.constant 0 : i32
    %c0_i32_1 = arith.constant 0 : i32
    return %arg0, %c0_i32, %c0_i32_0 : i32, i32, i32
  }
  func.func @transform_1(%arg0: i32) -> (i32, i32) {
    %c0_i32 = arith.constant 0 : i32
    %c0_i32_0 = arith.constant 0 : i32
    %c0_i32_1 = arith.constant 0 : i32
    return %c0_i32, %c0_i32_0 : i32, i32
  }
  func.func @transform_2(%arg0: i32) -> (i32, i32) {
    %c0_i32 = arith.constant 0 : i32
    %c0_i32_0 = arith.constant 0 : i32
    %c0_i32_1 = arith.constant 0 : i32
    return %c0_i32, %c0_i32_0 : i32, i32
  }
  func.func @transform_3(%arg0: i32) -> (i32, i32, i32) {
    %c0_i32 = arith.constant 0 : i32
    %c0_i32_0 = arith.constant 0 : i32
    %c0_i32_1 = arith.constant 0 : i32
    return %arg0, %c0_i32, %c0_i32_0 : i32, i32, i32
  }
}

</mosaic_0001>

<bundles_post_ra>
// kernel: tpu_custom_call.1
= control target key start
LH: loop header
LB: loop body
LE: loop exit
PB: predicated region body
PF: predicated region fallthrough
CT: control target
= control target key end

     0   :  { %8 = vsyncpa [#allocation3], 0  ;;  %s978_s0 = inlined_call_operand.hbm [shape: f32[4,16,16], index: 0, kind: input, shape index: {}]   ;;  %s979_s1 = inlined_call_operand.vmem [shape: f32[8,16], index: 1, kind: input, shape index: {}]   ;;  %s980_s2 = inlined_call_operand.vmem [shape: f32[16,8], index: 2, kind: input, shape index: {}]   ;;  %s981_s3 = inlined_call_operand.hbm [shape: f32[4,8,12], index: 3, kind: output, shape index: {}]  }
   0x1   :  { %10 = vsyncpa [#allocation3 + $0x1], 0 }
   0x2   :  { %11 = vsyncpa [#allocation4], 0 }
   0x3   :  { %13 = vsyncpa [#allocation4 + $0x1], 0  ;;  %s800_s12 = smov 0   ;;  %s802_s13 = smov 0  }
   0x4   :  { %s804_s14 = smov 0   ;;  %s806_s15 = smov 0  }
   0x5 LB: > { %s821_s16 = sadd.s32 4294967295, %s767_s15   ;;  %s545_s17 = sadd.s32 4294967294, %s767_s15   ;;  %s767_s15 = sphi %s806_s15, %s994_s15   ;;  %s763_s14 = sphi %s804_s14, %s993_s14   ;;  %s759_s13 = sphi %s802_s13, %s992_s13   ;;  %s755_s12 = sphi %s800_s12, %s991_s12  }
   0x6   : > { %s825_s18 = sadd.s32 1, %s767_s15   ;;  %s26_s19 = sadd.s32 1, %s763_s14 }
   0x7   : > { %s23_s20 = ssub.s32 %s767_s15, %s825_s18  ;;  %p33_p0 = scmp.ne.s32.totalorder %s763_s14, %s759_s13 }
   0x8   : > { %p24_p1 = scmp.eq.s32.totalorder %s23_s20, 0  ;;  %p34_p2 = scmp.eq.s32.totalorder %s767_s15, 0 }
   0x9   : > { %p39_p3 = scmp.ne.s32.totalorder %s759_s13, %s755_s12  ;;  %p40_p4 = scmp.eq.s32.totalorder %s821_s16, 0 }
   0xa   : > { %s837_s21 = scalar_select %p24_p1, %s763_s14, %s26_s19  }
   0xb   : > { %p839_p5 = por %p34_p2, %p33_p0  ;;  %p843_p6 = por %p40_p4, %p39_p3 }
   0xc   : > { %p105_p7 = scmp.eq.s32.totalorder %s821_s16, 1  ;;  %p111_p8 = scmp.eq.s32.totalorder %s545_s17, 1 }
   0xd   : > { %p628_p10 = scmp.lt.s32.totalorder %s767_s15, 2  ;;  %s137_s26 = sand.u32 1, %s763_s14  }
   0xe   : > { %p850_p11 = por %p105_p7, %p33_p0  ;;  %p854_p12 = por %p111_p8, %p39_p3 }
   0xf   : > { %s568_s27 = sshll.u32 %s767_s15, 9  ;;  %s548_s28 = sshll.u32 %s137_s26, 5 }
  0x10   : > { %s985_s24 = scalar_select %p850_p11, 1, 0 }
  0x11   : > { %s986_s25 = scalar_select %p854_p12, 1, 0 }
  0x12   : > { %s863_s4 = scalar_lea.hbm %s978_s0, %s568_s27  ;;  %s141_s5 = scalar_lea.vmem [#allocation2], %s548_s28 }
  0x13   : > { %s149_s6 = sshll.u32 %s141_s5, 4  ;;  %p867_p13 = pnand %p628_p10, %p839_p5  ;;  %s871_s6 = int_to_ptr.vmem [resolvable:$true] %s149_s6 }
  0x14   : > { %s873_s8 = scalar_lea.sflag [#allocation3], %s137_s26  ;;  %s671_s9 = scalar_lea.hbm %s863_s4, 512 }
  0x15   : > { %p672_p0 = scmp.ne.s32.totalorder %s863_s4, %s671_s9  ;;  %p673_p1 = pneg %p867_p13 }
  0x16   : > { %s676_s17 = scalar_lea.hbm %s978_s0, 1024  ;;  %p677_p4 = scmp.lt.u32.totalorder %s863_s4, %s978_s0 }
  0x17   : > { %p674_p2 = pnand %p673_p1, %p672_p0  ;;  %p678_p5 = scmp.lt.u32.totalorder %s676_s17, %s671_s9 }
  0x18   : > { %p680_p8 = scmp.lt.u32.totalorder %s671_s9, %s863_s4 }
  0x19   : > { %p675_p3 = pneg %p674_p2  ;;  %p679_p7 = por %p678_p5, %p677_p4 }
  0x1b   : > { %p681_p10 = por %p680_p8, %p679_p7 }
  0x1d   : > { %p682_p9 = pnand %p681_p10, %p675_p3 }
  0x1f   : > { %685 = shalt.err (!%p682_p9)
}
  0x20   : > { %s686_s22 = scalar_lea.vmem %s871_s6, 512  ;;  %s769_s26 = smov [#allocation2]  }
  0x21   : > { %p687_p0 = scmp.ne.s32.totalorder %s871_s6, %s686_s22  ;;  %s691_s27 = sshll.u32 %s769_s26, 4  ;;  %s692_s27 = int_to_ptr.vmem [resolvable:$false] %s691_s27 }
  0x22   : > { %s693_s28 = scalar_lea.vmem %s692_s27, 1024  ;;  %p694_p11 = scmp.lt.s32.totalorder %s871_s6, %s692_s27 }
  0x23   : > { %p689_p2 = pnand %p687_p0, %p673_p1  ;;  %p695_p4 = scmp.lt.s32.totalorder %s693_s28, %s686_s22 }
  0x25   : > { %p690_p12 = pneg %p689_p2  ;;  %p696_p5 = por %p695_p4, %p694_p11 }
  0x27   : > { %p697_p7 = pnand %p696_p5, %p690_p12 }
  0x29   : > { %700 = shalt.err (!%p697_p7)
}
  0x2a   : > { %s770_s29 = smov 128   ;;  %s771_s30 = smov 8  }
  0x2b   : > { %623 = dma.hbm_to_vmem [thread:$0]  (!%p867_p13), %s863_s4, 512, %s871_s6, %s873_s8, %s770_s29, %s770_s29, %s771_s30  }
  0x2c   : > { %p552_p9 = scmp.ge.s32.totalorder %s767_s15, 1  ;;  %p157_p1 = scmp.lt.s32.totalorder %s767_s15, 3 }
  0x2e   : > { %p158_p3 = pnand %p552_p9, %p157_p1 }
  0x2f   : > { %s904_s5 = sand.u32 (!%p158_p3), 1, %s759_s13  }
  0x30   : > { %161 = sbr.rel (%p158_p3) target bundleno = 627 (0x273), region = 32  ;;  %s553_s9 = sshll.u32 (!%p158_p3), %s904_s5, 5 }
  0x31   : > { %s164_s10 = scalar_lea.sflag (!%p158_p3), [#allocation3], %s904_s5  ;;  %s167_s11 = scalar_lea.vmem (!%p158_p3), [#allocation2], %s553_s9 }
  0x37   : > { %746 = dma.done.wait (%p843_p6), %s164_s10, 512  }
  0x38   : > { %748 = vsyncadd (%p843_p6), %s164_s10, 4294966784  ;;  %vm205_vm0 = vcmask 130048   ;;  %v199_v0 = vld [vmem:[%s980_s2] sm:$0xff]  ;;  %v200_v1 = vld [vmem:[%s980_s2 + $0x8] sm:$0xff]  ;;  %v772_v7 = vmov 0.0|0.0   ;;  %vm773_vm1 = vmmov 0  }
  0x39   : > { %v201_v2 = vld [vmem:[%s167_s11] sm:$0xff]  ;;  %v606_v3 = vpack.c.bf16 %v200_v1, %v199_v0  ;;  %v202_v4 = vld [vmem:[%s167_s11 + $0x8] sm:$0xff]  ;;  %v203_v5 = vld [vmem:[%s167_s11 + $0x10] sm:$0xff]  ;;  %610 = vmatprep.subr.bf16.mxu1 %v772_v7  ;;  %v774_v8 = vmov 0.0   ;;  %s554_s19 = sshll.u32 %s904_s5, 4  ;;  %vm192_vm2 = vcmask 15360  }
  0x3a   : > { %586 = vmatprep.mubr.msk.f32.mxu0 %vm205_vm0, %v201_v2  ;;  %v204_v6 = vld [vmem:[%s167_s11 + $0x18] sm:$0xff]  ;;  %596 = vmatprep.mubr.msk.f32.mxu1 %vm773_vm1, %v774_v8  ;;  %v198_v13 = vld [vmem:[%s979_s1] sm:$0xff]  ;;  %vm195_vm3 = vcmask 97360   ;;  %s189_s20 = scalar_lea.vmem [#allocation5], %s554_s19  ;;  %v775_v16 = vmov 0.5   ;;  %s776_s22 = smov 2  }
  0x3b   : > { %607 = vmatprep.subr.bf16.mxu0 %v606_v3  ;;  %193 = vst.msk [vmem:[%s189_s20] sm:$0xff] %vm192_vm2, %v775_v16  ;;  %194 = vst.msk [vmem:[%s189_s20 + $0x8] sm:$0xff] %vm192_vm2, %v775_v16  ;;  %vm380_vm4 = vcmask 80912   ;;  %s569_s26 = sshll.u32 %s821_s16, 8  ;;  %s472_s27 = sshll.u32 %s189_s20, 4  ;;  %s934_s27 = int_to_ptr.vmem [resolvable:$true] %s472_s27 }
  0x3c   : > { %609 = vmatpush3.bf16.msra.mxu0 %v606_v3  ;;  %196 = vst.msk [vmem:[%s189_s20] sm:$0xff] %vm195_vm3, %v775_v16  ;;  %197 = vst.msk [vmem:[%s189_s20 + $0x8] sm:$0xff] %vm195_vm3, %v775_v16  ;;  %s932_s30 = scalar_lea.hbm %s981_s3, %s569_s26  ;;  %s459_s9 = scalar_lea.sflag [#allocation4], %s904_s5 }
  0x3d   : > { %s701_s10 = scalar_lea.vmem %s934_s27, 256  ;;  %p988_p11 = scmp.ne.s32.totalorder %s985_s24, 0 }
  0x3e   : > { %p702_p6 = scmp.ne.s32.totalorder %s934_s27, %s701_s10  ;;  %s777_s16 = smov [#allocation5]  }
  0x3f   : > { %587 = vmatmul.mubr.msk.f32.vlgmr.msra.gmra.mrb[0].mxu0 %vm205_vm0, %v202_v4  ;;  %s705_s11 = sshll.u32 %s777_s16, 4  ;;  %s706_s11 = int_to_ptr.vmem [resolvable:$false] %s705_s11 }
  0x40   : > { %589 = vmatprep.mubr.msk.f32.mxu0 %vm205_vm0, %v203_v5  ;;  %p703_p12 = pnand %p702_p6, %p988_p11  ;;  %s707_s4 = scalar_lea.vmem %s706_s11, 512 }
  0x41   : > { %p708_p8 = scmp.lt.s32.totalorder %s934_s27, %s706_s11  ;;  %p709_p10 = scmp.lt.s32.totalorder %s707_s4, %s701_s10 }
  0x42   : > { %p704_p13 = pneg %p703_p12 }
  0x43   : > { %590 = vmatmul.mubr.msk.f32.gmra.mrb[2].mxu0 %vm205_vm0, %v204_v6  ;;  %p710_p0 = por %p709_p10, %p708_p8 }
  0x45   : > { %p711_p2 = pnand %p710_p0, %p704_p13 }
 0x112   : > { %v588_v9 = vpop.f32.mrb[0].mxu0 }
 0x113   : > { %v284_v10 = vpop.f32.mrb[1].mxu0 }
 0x114   : > { %v611_v11 = vpack.c.bf16 %v588_v9, %v284_v10 }
 0x116   : > { %v591_v12 = vpop.f32.mrb[2].mxu0  ;;  %612 = vmatpush3.bf16.msra.mxu1 %v611_v11 }
 0x117   : > { %v294_v14 = vpop.f32.mrb[3].mxu0  ;;  %613 = vmatprep.subr.bf16.mxu1 %v772_v7 }
 0x118   : > { %v614_v15 = vpack.c.bf16 %v591_v12, %v294_v14 }
 0x119   : > { %597 = vmatmul.mubr.msk.f32.vlgmr.msra.gmra.mrb[0].mxu1 %vm205_vm0, %v198_v13 }
 0x11a   : > { %615 = vmatpush3.bf16.msra.mxu1 %v614_v15  ;;  %603 = vmatprep.mubr.msk.f32.mxu1 %vm773_vm1, %v774_v8 }
 0x11d   : > { %604 = vmatmul.mubr.msk.f32.vlgmr.msra.gmra.mrb[2].mxu1 %vm205_vm0, %v198_v13 }
 0x1ec   : > { %v372_v17 = vpop.f32.mrb[0].mxu1 }
 0x1ed   : > { %v598_v18 = vpop.f32.mrb[1].mxu1  ;;  %377 = vrot.lane.b32.xlu0 %v372_v17, %s776_s22 }
 0x1f0   : > { %v448_v19 = vpop.f32.mrb[2].mxu1 }
 0x1f1   : > { %v605_v20 = vpop.f32.mrb[3].mxu1  ;;  %453 = vrot.lane.b32.xlu0 %v448_v19, %s776_s22 }
 0x25f   : > { %v378_v21 = vpop.permute.xlu0 %377 }
 0x260   : > { %381 = vst.msk [vmem:[%s189_s20] sm:$0xff] %vm380_vm4, %v378_v21 }
 0x263   : > { %v454_v22 = vpop.permute.xlu0 %453 }
 0x264   : > { %561 = vst.msk [vmem:[%s189_s20 + $0x8] sm:$0xff] %vm380_vm4, %v454_v22 }
 0x265   : > { %714 = shalt.err (!%p711_p2)
}
 0x266   : > { %s715_s6 = scalar_lea.hbm %s932_s30, 256  ;;  %s719_s23 = scalar_lea.hbm %s981_s3, 512 }
 0x267   : > { %p716_p4 = scmp.ne.s32.totalorder %s932_s30, %s715_s6  ;;  %p720_p9 = scmp.lt.u32.totalorder %s932_s30, %s981_s3 }
 0x268   : > { %p721_p1 = scmp.lt.u32.totalorder %s719_s23, %s715_s6  ;;  %p723_p6 = scmp.lt.u32.totalorder %s715_s6, %s932_s30 }
 0x269   : > { %p717_p5 = pnand %p716_p4, %p988_p11 }
 0x26a   : > { %p722_p3 = por %p721_p1, %p720_p9 }
 0x26b   : > { %p718_p7 = pneg %p717_p5 }
 0x26c   : > { %p724_p12 = por %p723_p6, %p722_p3 }
 0x26e   : > { %p725_p13 = pnand %p724_p12, %p718_p7 }
 0x270   : > { %728 = shalt.err (!%p725_p13)
}
 0x271   : > { %s778_s20 = smov 128   ;;  %s779_s22 = smov 8  }
 0x272   : > { %618 = dma.vmem_to_hbm [thread:$0]  (%p988_p11), %s934_s27, 256, %s932_s30, %s459_s9, %s778_s20, %s778_s20, %s779_s22  }
 0x273 PF: > { %s487_s26 = sand.u32 1, %s755_s12   ;;  %p989_p8 = scmp.ne.s32.totalorder %s986_s25, 0 }
 0x274   : > { %p990_p10 = scmp.ge.s32.totalorder %s767_s15, 2  ;;  %s488_s28 = scalar_lea.sflag [#allocation4], %s487_s26 }
 0x276   : > { %p625_p0 = pnand %p990_p10, %p989_p8 }
 0x278   : > { %750 = dma.done.wait (!%p625_p0), %s488_s28, 256  }
 0x279   : > { %752 = vsyncadd (!%p625_p0), %s488_s28, 4294967040  ;;  %p16_p2 = scmp.ge.s32.totalorder %s825_s18, 4   ;;  %s991_s12 = smov %s759_s13 }
 0x27a   : > { %s992_s13 = smov %s763_s14  ;;  %s993_s14 = smov %s837_s21 }
 0x27b   : > { %s994_s15 = smov %s825_s18  ;;  %18 = sbr.rel (!%p16_p2) target bundleno = 5 (0x5), region = 78 }
 0x282   :  { %493 = vsyncpa [#allocation3], 1 }
 0x283   :  { %495 = vsyncpa [#allocation3 + $0x1], 1 }
 0x284   :  { %496 = vsyncpa [#allocation4], 1 }
 0x285   :  { %498 = vsyncpa [#allocation4 + $0x1], 1 }

</bundles_post_ra>
